<compile_context>
chip_gen: v5e
topology: v5e:2x2
jax: 0.10.0
libtpu: 0.0.40
codegen_flags: <defaults>
</compile_context>

<pallas_src>
import functools

import jax
import jax.numpy as jnp
from jax.experimental import pallas as pl
from jax.experimental.pallas import tpu as pltpu

_LANES = 128


def _row_losses(q, p, n, *, margin, distance):
    """Per-row triplet losses for a (TB, D) float32 tile; returns (TB, 1)."""
    if distance == "l2-norm":
        # F.pairwise_distance default: p=2, eps=1e-6 added to the difference.
        eps = 1e-6
        dpos = jnp.sqrt(jnp.sum((q - p + eps) ** 2, axis=-1, keepdims=True))
        dneg = jnp.sqrt(jnp.sum((q - n + eps) ** 2, axis=-1, keepdims=True))
        return jnp.maximum(dpos - dneg + margin, 0.0)
    if distance == "cosine":
        # F.cosine_similarity default: dim=1, eps=1e-8.  rsqrt lowers to the
        # otherwise-idle EUP slot instead of a VALU sqrt + divide chain.
        eps = 1e-8
        inv_q = jax.lax.rsqrt(jnp.maximum(jnp.sum(q * q, -1, keepdims=True), eps * eps))
        inv_p = jax.lax.rsqrt(jnp.maximum(jnp.sum(p * p, -1, keepdims=True), eps * eps))
        inv_n = jax.lax.rsqrt(jnp.maximum(jnp.sum(n * n, -1, keepdims=True), eps * eps))
        spos = jnp.sum(q * p, -1, keepdims=True) * (inv_q * inv_p)
        sneg = jnp.sum(q * n, -1, keepdims=True) * (inv_q * inv_n)
        return jnp.maximum(-spos + sneg + margin, 0.0)
    if distance == "dot":
        # torch.bmm(q[:,None,:], p[:,:,None]) == per-row dot product.
        spos = jnp.sum(q * p, -1, keepdims=True)
        sneg = jnp.sum(q * n, -1, keepdims=True)
        return jnp.maximum(-spos + sneg + margin, 0.0)
    raise TypeError(f"Unrecognized option for `distance`:{distance}")


def _partial_sum_kernel(q_ref, p_ref, n_ref, out_ref, *, margin, distance,
                        batch, block_rows, has_tail):
    """mean/sum: per-block partial sum -> lane 0 of a disjoint (1,128) block."""
    q = q_ref[...].astype(jnp.float32)
    p = p_ref[...].astype(jnp.float32)
    n = n_ref[...].astype(jnp.float32)
    losses = _row_losses(q, p, n, margin=margin, distance=distance)  # (TB, 1)
    lane = jax.lax.broadcasted_iota(jnp.int32, out_ref.shape, 1)

    def store_psum(vals):
        out_ref[...] = jnp.where(lane == 0, jnp.sum(vals), 0.0)

    if has_tail:
        # Only the last block contains padded rows; full blocks skip the
        # iota/compare/select entirely.
        i = pl.program_id(0)
        last = pl.num_programs(0) - 1

        @pl.when(i != last)
        def _full():
            store_psum(losses)

        @pl.when(i == last)
        def _tail():
            row = i * block_rows + jax.lax.broadcasted_iota(
                jnp.int32, losses.shape, 0)
            store_psum(jnp.where(row < batch, losses, 0.0))
    else:
        store_psum(losses)


def _none_kernel(q_ref, p_ref, n_ref, out_ref, *, margin, distance):
    """reduction == 'none': per-row losses into disjoint (TB, 1) blocks."""
    q = q_ref[...].astype(jnp.float32)
    p = p_ref[...].astype(jnp.float32)
    n = n_ref[...].astype(jnp.float32)
    out_ref[...] = _row_losses(q, p, n, margin=margin, distance=distance)


def _vmem_capacity_bytes():
    try:
        cap = getattr(pltpu.get_tpu_info(), "vmem_capacity_bytes", None)
        if cap:
            return int(cap)
    except Exception:
        pass
    return 64 << 20  # conservative fallback: v7x per-TensorCore VMEM


def triplet_loss(query, positive, negative, *, margin=1.0, distance="l2-norm",
                 reduction="mean", block_rows=None):
    assert query.ndim == 2 and query.shape == positive.shape == negative.shape
    if distance not in ("l2-norm", "cosine", "dot"):
        raise TypeError(f"Unrecognized option for `distance`:{distance}")
    if reduction not in ("mean", "sum", "none"):
        raise TypeError(f"Unrecognized option for `reduction`:{reduction}")

    B, D = query.shape
    itemsize = jnp.dtype(query.dtype).itemsize
    margin = float(margin)
    sublane = {1: 32, 2: 16}.get(itemsize, 8)  # packed-sublane multiple

    vmem_cap = _vmem_capacity_bytes()
    # Input double-buffer budget: ~40 MiB on v5e/v6e (128 MiB VMEM), ~28 MiB on
    # v7x (64 MiB physical per TensorCore), never below 12 MiB.
    input_budget = min(40 << 20, max(vmem_cap // 2 - (4 << 20), 12 << 20))

    if block_rows is None:
        # 3 inputs x 2 pipeline buffers x (TB * D * itemsize) must fit the
        # budget; no artificial row cap so small-D cases still get multi-MiB
        # blocks that amortize the fixed per-grid-step overhead.
        budget_rows = max(1, input_budget // (3 * 2 * D * itemsize))
        block_rows = max(sublane, (budget_rows // sublane) * sublane)
    block_rows = int(block_rows)
    if block_rows >= B:
        block_rows = B  # single full-extent block (legal for any B)
    else:
        block_rows = max(sublane, (block_rows // sublane) * sublane)

    num_blocks = (B + block_rows - 1) // block_rows
    has_tail = (B % block_rows) != 0
    grid = (num_blocks,)
    # TODO(synk): for very large D (>~100K f32) also tile the feature dim with a
    # 2-D grid + per-row partial-sum scratch so one tile never exceeds v7x VMEM.

    in_specs = [pl.BlockSpec((block_rows, D), lambda i: (i, 0))] * 3

    input_bytes = 3 * 2 * block_rows * D * itemsize
    vmem_limit = int(min(max(input_bytes + (8 << 20), 32 << 20),
                         vmem_cap - (8 << 20)))
    compiler_params = pltpu.CompilerParams(
        # No resident accumulator on any path -> every grid axis is parallel,
        # so v7x's two TensorCores each stream half the batch.
        dimension_semantics=("parallel",),
        vmem_limit_bytes=vmem_limit,
    )

    transcendentals = {"l2-norm": 2 * B, "cosine": 3 * B, "dot": 0}[distance]
    out_bytes = (B if reduction == "none" else num_blocks * _LANES) * 4
    cost = pl.CostEstimate(
        flops=8 * B * D,
        transcendentals=transcendentals,
        bytes_accessed=3 * B * D * itemsize + out_bytes,
    )

    if reduction == "none":
        kernel = functools.partial(_none_kernel, margin=margin,
                                   distance=distance)
        out = pl.pallas_call(
            kernel,
            grid=grid,
            in_specs=in_specs,
            out_specs=pl.BlockSpec((block_rows, 1), lambda i: (i, 0)),
            out_shape=jax.ShapeDtypeStruct((B, 1), jnp.float32),
            compiler_params=compiler_params,
            cost_estimate=cost,
        )(query, positive, negative)
        # TODO(synk): a lane-dense (1, B) output (needs an in-kernel (TB,1) ->
        # (1,TB) relayout) would avoid 1-lane masked stores; skipped since the
        # kernel is read-dominated and the win is a few % at most.
        return out[:, 0]

    # mean / sum: disjoint lane-dense partial-sum blocks, reduced outside.
    kernel = functools.partial(_partial_sum_kernel, margin=margin,
                               distance=distance, batch=B,
                               block_rows=block_rows, has_tail=has_tail)
    partials = pl.pallas_call(
        kernel,
        grid=grid,
        in_specs=in_specs,
        out_specs=pl.BlockSpec((1, _LANES), lambda i: (0, i)),
        out_shape=jax.ShapeDtypeStruct((1, _LANES * num_blocks), jnp.float32),
        compiler_params=compiler_params,
        cost_estimate=cost,
    )(query, positive, negative)
    total = jnp.sum(partials)  # tiny host-side XLA reduce over num_blocks*128
    if reduction == "mean":
        return total / jnp.float32(B)
    return total


def _reference(query, positive, negative, *, margin=1.0,
               distance="l2-norm", reduction="mean"):
    q = query.astype(jnp.float32)
    p = positive.astype(jnp.float32)
    n = negative.astype(jnp.float32)
    if distance == "l2-norm":
        eps = 1e-6
        dp = jnp.sqrt(jnp.sum((q - p + eps) ** 2, axis=-1))
        dn = jnp.sqrt(jnp.sum((q - n + eps) ** 2, axis=-1))
        losses = jnp.maximum(dp - dn + margin, 0.0)
    elif distance == "cosine":
        eps = 1e-8
        qn = jnp.maximum(jnp.linalg.norm(q, axis=-1), eps)
        pn = jnp.maximum(jnp.linalg.norm(p, axis=-1), eps)
        nn = jnp.maximum(jnp.linalg.norm(n, axis=-1), eps)
        losses = jnp.maximum(-(jnp.sum(q * p, -1) / (qn * pn))
                             + (jnp.sum(q * n, -1) / (qn * nn)) + margin, 0.0)
    else:  # dot
        losses = jnp.maximum(-jnp.sum(q * p, -1) + jnp.sum(q * n, -1) + margin, 0.0)
    if reduction == "mean":
        return losses.mean()
    if reduction == "sum":
        return losses.sum()
    return losses


if __name__ == "__main__":
    key = jax.random.PRNGKey(0)
    ok = True

    # Case 1: small single-block case (B=8, D=32).
    # Case 2: multi-block grid with partial last block (B=20, block_rows=8):
    #         exercises the partial-sum + tail-masking paths.
    # Case 3: larger multi-block grid with a partial last block (B=300, tb=128).
    for (B, D, tb) in ((8, 32, None), (20, 32, 8), (300, 32, 128)):
        kq, kp, kn, key = jax.random.split(key, 4)
        query = jax.random.normal(kq, (B, D), dtype=jnp.float32)
        positive = jax.random.normal(kp, (B, D), dtype=jnp.float32)
        negative = jax.random.normal(kn, (B, D), dtype=jnp.float32)

        for distance in ("l2-norm", "cosine", "dot"):
            for reduction in ("mean", "sum", "none"):
                out = triplet_loss(query, positive, negative, margin=1.0,
                                   distance=distance, reduction=reduction,
                                   block_rows=tb)
                out = jax.block_until_ready(out)
                ref = _reference(query, positive, negative, margin=1.0,
                                 distance=distance, reduction=reduction)
                if not jnp.allclose(out, ref, atol=1e-4, rtol=1e-4):
                    ok = False
                    print(f"MISMATCH B={B} tb={tb} distance={distance} "
                          f"reduction={reduction}")

    if ok:
        print("KERNEL_OK")
</pallas_src>

<mosaic_0001>
module attributes {stable_mosaic.version = 11 : i64} {
  func.func @_partial_sum_kernel(%arg0: i32, %arg1: memref<8x32xf32, #tpu.memory_space<vmem>>, %arg2: memref<8x32xf32, #tpu.memory_space<vmem>>, %arg3: memref<8x32xf32, #tpu.memory_space<vmem>>, %arg4: memref<1x128xf32, #tpu.memory_space<vmem>>) attributes {dimension_semantics = [#tpu.dimension_semantics<parallel>], iteration_bounds = array<i64: 1>, scalar_prefetch = 0 : i64, scratch_operands = 0 : i64, tpu.core_type = #tpu.core_type<tc>, window_params = [{transform_indices = @transform_0, window_bounds = array<i64: 8, 32>}, {transform_indices = @transform_1, window_bounds = array<i64: 8, 32>}, {transform_indices = @transform_2, window_bounds = array<i64: 8, 32>}, {transform_indices = @transform_3, window_bounds = array<i64: 1, 128>}]} {
    %c0 = arith.constant 0 : index
    %c0_0 = arith.constant 0 : index
    %0 = vector.load %arg1[%c0, %c0_0] : memref<8x32xf32, #tpu.memory_space<vmem>>, vector<8x32xf32>
    %c0_1 = arith.constant 0 : index
    %c0_2 = arith.constant 0 : index
    %1 = vector.load %arg2[%c0_1, %c0_2] : memref<8x32xf32, #tpu.memory_space<vmem>>, vector<8x32xf32>
    %c0_3 = arith.constant 0 : index
    %c0_4 = arith.constant 0 : index
    %2 = vector.load %arg3[%c0_3, %c0_4] : memref<8x32xf32, #tpu.memory_space<vmem>>, vector<8x32xf32>
    %3 = arith.subf %0, %1 : vector<8x32xf32>
    %cst = arith.constant 9.99999997E-7 : f32
    %4 = vector.broadcast %cst : f32 to vector<8x32xf32>
    %5 = arith.addf %3, %4 : vector<8x32xf32>
    %6 = arith.mulf %5, %5 : vector<8x32xf32>
    %cst_5 = arith.constant dense<0.000000e+00> : vector<8xf32>
    %7 = vector.multi_reduction <add>, %6, %cst_5 [1] : vector<8x32xf32> to vector<8xf32>
    %8 = vector.shape_cast %7 : vector<8xf32> to vector<8x1xf32>
    %9 = math.sqrt %8 : vector<8x1xf32>
    %10 = arith.subf %0, %2 : vector<8x32xf32>
    %cst_6 = arith.constant 9.99999997E-7 : f32
    %11 = vector.broadcast %cst_6 : f32 to vector<8x32xf32>
    %12 = arith.addf %10, %11 : vector<8x32xf32>
    %13 = arith.mulf %12, %12 : vector<8x32xf32>
    %cst_7 = arith.constant dense<0.000000e+00> : vector<8xf32>
    %14 = vector.multi_reduction <add>, %13, %cst_7 [1] : vector<8x32xf32> to vector<8xf32>
    %15 = vector.shape_cast %14 : vector<8xf32> to vector<8x1xf32>
    %16 = math.sqrt %15 : vector<8x1xf32>
    %17 = arith.subf %9, %16 : vector<8x1xf32>
    %cst_8 = arith.constant 1.000000e+00 : f32
    %18 = vector.broadcast %cst_8 : f32 to vector<8x1xf32>
    %19 = arith.addf %17, %18 : vector<8x1xf32>
    %cst_9 = arith.constant 0.000000e+00 : f32
    %20 = vector.broadcast %cst_9 : f32 to vector<8x1xf32>
    %21 = arith.maximumf %19, %20 : vector<8x1xf32>
    %22 = tpu.iota {dimensions = array<i32: 1>} : vector<1x128xi32>
    %c0_i32 = arith.constant 0 : i32
    %23 = vector.broadcast %c0_i32 : i32 to vector<1x128xi32>
    %24 = arith.cmpi eq, %22, %23 : vector<1x128xi32>
    %25 = vector.shape_cast %21 : vector<8x1xf32> to vector<1x8x1xf32>
    %cst_10 = arith.constant dense<0.000000e+00> : vector<1xf32>
    %26 = vector.multi_reduction <add>, %25, %cst_10 [1, 2] : vector<1x8x1xf32> to vector<1xf32>
    %27 = vector.shape_cast %26 : vector<1xf32> to vector<1x1x1xf32>
    %28 = vector.extract %27[0, 0, 0] : f32 from vector<1x1x1xf32>
    %cst_11 = arith.constant 0.000000e+00 : f32
    %29 = vector.broadcast %28 : f32 to vector<1x128xf32>
    %30 = vector.broadcast %cst_11 : f32 to vector<1x128xf32>
    %31 = arith.select %24, %29, %30 : vector<1x128xi1>, vector<1x128xf32>
    %c0_12 = arith.constant 0 : index
    %c0_13 = arith.constant 0 : index
    %32 = vector.load %arg4[%c0_12, %c0_13] : memref<1x128xf32, #tpu.memory_space<vmem>>, vector<1x128xf32>
    tpu.vector_store %arg4[%c0_12, %c0_13], %31 {strides = array<i32>} : memref<1x128xf32, #tpu.memory_space<vmem>>, vector<1x128xf32>,
    return
  }
  func.func @transform_0(%arg0: i32) -> (i32, i32) {
    %c0_i32 = arith.constant 0 : i32
    %c0_i32_0 = arith.constant 0 : i32
    return %arg0, %c0_i32 : i32, i32
  }
  func.func @transform_1(%arg0: i32) -> (i32, i32) {
    %c0_i32 = arith.constant 0 : i32
    %c0_i32_0 = arith.constant 0 : i32
    return %arg0, %c0_i32 : i32, i32
  }
  func.func @transform_2(%arg0: i32) -> (i32, i32) {
    %c0_i32 = arith.constant 0 : i32
    %c0_i32_0 = arith.constant 0 : i32
    return %arg0, %c0_i32 : i32, i32
  }
  func.func @transform_3(%arg0: i32) -> (i32, i32) {
    %c0_i32 = arith.constant 0 : i32
    %c0_i32_0 = arith.constant 0 : i32
    return %c0_i32, %arg0 : i32, i32
  }
}

</mosaic_0001>

<bundles_post_ra>
// kernel: tpu_custom_call.1
= control target key start
LH: loop header
LB: loop body
LE: loop exit
PB: predicated region body
PF: predicated region fallthrough
CT: control target
= control target key end

     0   :  { %8 = vsyncpa [#allocation3], 0  ;;  %s282_s0 = inlined_call_operand.hbm [shape: f32[8,32], index: 0, kind: input, shape index: {}]   ;;  %s283_s1 = inlined_call_operand.hbm [shape: f32[8,32], index: 1, kind: input, shape index: {}]   ;;  %s284_s2 = inlined_call_operand.hbm [shape: f32[8,32], index: 2, kind: input, shape index: {}]   ;;  %s285_s3 = inlined_call_operand.hbm [shape: f32[1,128], index: 3, kind: output, shape index: {}]  }
   0x1   :  { %9 = vsyncpa [#allocation6], 0  ;;  %s27_s14 = sshll.u32 %s283_s1, 4  ;;  %s28_s14 = int_to_ptr.hbm [resolvable:$true] %s27_s14 }
   0x2   :  { %10 = vsyncpa [#allocation4], 0  ;;  %s246_s15 = smov [#allocation5]   ;;  %s16_s19 = sshll.u32 %s282_s0, 4  ;;  %s17_s19 = int_to_ptr.hbm [resolvable:$true] %s16_s19 }
   0x3   :  { %s29_s16 = sshll.u32 %s246_s15, 4  ;;  %s247_s20 = smov [#allocation2]   ;;  %s30_s16 = int_to_ptr.vmem [resolvable:$true] %s29_s16 }
   0x4   :  { %32 = dma.hbm_to_vmem [thread:$0]  %s28_s14, 128, %s30_s16, [#allocation6]  }
   0x5   :  { %s18_s21 = sshll.u32 %s247_s20, 4  ;;  %s38_s24 = sshll.u32 %s284_s2, 4  ;;  %s19_s21 = int_to_ptr.vmem [resolvable:$true] %s18_s21  ;;  %s39_s24 = int_to_ptr.hbm [resolvable:$true] %s38_s24 }
   0x6   :  { %21 = dma.hbm_to_vmem [thread:$0]  %s17_s19, 128, %s19_s21, [#allocation3]  }
   0x7   :  { %s248_s1 = smov [#allocation7]  }
   0x8   :  { %s40_s25 = sshll.u32 %s248_s1, 4  ;;  %s41_s25 = int_to_ptr.vmem [resolvable:$true] %s40_s25 }
   0x9   :  { %43 = dma.hbm_to_vmem [thread:$0]  %s39_s24, 128, %s41_s25, [#allocation6]  }
   0xa   :  { %240 = dma.done.wait [#allocation3], 128  }
   0xb   :  { %241 = vsyncadd [#allocation3], 4294967168 }
   0xc   :  { %242 = dma.done.wait [#allocation6], 256  }
   0xd   :  { %243 = vsyncadd [#allocation6], 4294967040  ;;  %v56_v0 = vld [vmem:[#allocation2] sm:$0xff]  ;;  %v57_v1 = vld [vmem:[#allocation5] sm:$0xff]  ;;  %vm62_vm0 = vcmask 261120   ;;  %vm102_vm5 = vcmask 7168   ;;  %v99_v44 = vlaneseq }
   0xe   :  { %v58_v2 = vld [vmem:[#allocation7] sm:$0xff]  ;;  %v59_v3 = vsub.f32 %v56_v0, %v57_v1  ;;  %s249_s0 = smov [#allocation8]   ;;  %s123_s28 = sshll.u32 %s285_s3, 4  ;;  %s124_s28 = int_to_ptr.hbm [resolvable:$true] %s123_s28 }
   0xf   :  { %v78_v4 = vsub.f32 %v56_v0, %v58_v2  ;;  %v100_v45 = vand.u32 127, %v99_v44  ;;  %s121_s2 = sshll.u32 %s249_s0, 4  ;;  %s122_s2 = int_to_ptr.vmem [resolvable:$true] %s121_s2 }
  0x10   :  { %v60_v5 = vadd.f32 1e-06, %v59_v3 }
  0x11   :  { %v79_v7 = vadd.f32 1e-06, %v78_v4  ;;  %vm101_vm6 = vcmp.eq.s32.totalorder %v100_v45, 0 }
  0x12   :  { %v61_v6 = vmul.f32 %v60_v5, %v60_v5 }
  0x13   :  { %v80_v9 = vmul.f32 %v79_v7, %v79_v7 }
  0x14   :  { %v63_v8 = vsel %vm62_vm0, %v61_v6, 0.0 }
  0x15   :  { %64 = vadd.xlane.f32.xlu0 %v63_v8  ;;  %v81_v10 = vsel %vm62_vm0, %v80_v9, 0.0 }
  0x1d   :  { %82 = vadd.xlane.f32.xlu0 %v81_v10 }
  0x88   :  { %v65_v11 = vpop.xlane.xlu0 %64 }
  0x89   :  { %140 = vrsqrt.f32 %v65_v11  ;;  %vm73_vm1 = vcmp.eq.f32.partialorder %v65_v11, inf  ;;  %v76_v28 = vand.u32 2147483648, %v65_v11  ;;  %vm75_vm3 = vcmp.eq.f32.partialorder %v65_v11, 0.0 }
  0x8f   :  { %v141_v12 = vpop.eup %140 }
  0x90   :  { %v67_v13 = vmul.f32 %v141_v12, %v65_v11  ;;  %v83_v14 = vpop.xlane.xlu0 %82 }
  0x91   :  { %142 = vrsqrt.f32 %v83_v14  ;;  %vm91_vm2 = vcmp.eq.f32.partialorder %v83_v14, inf  ;;  %v94_v29 = vand.u32 2147483648, %v83_v14  ;;  %vm93_vm4 = vcmp.eq.f32.partialorder %v83_v14, 0.0 }
  0x92   :  { %v68_v15 = vmul.f32 %v141_v12, %v67_v13 }
  0x94   :  { %v69_v16 = vmul.f32 0.5, %v68_v15 }
  0x96   :  { %v70_v17 = vsub.f32 1.5, %v69_v16 }
  0x97   :  { %v143_v18 = vpop.eup %142 }
  0x98   :  { %v85_v19 = vmul.f32 %v143_v18, %v83_v14  ;;  %v71_v21 = vmul.f32 %v141_v12, %v70_v17 }
  0x9a   :  { %v86_v20 = vmul.f32 %v143_v18, %v85_v19  ;;  %v72_v23 = vmul.f32 %v71_v21, %v65_v11 }
  0x9c   :  { %v87_v22 = vmul.f32 0.5, %v86_v20  ;;  %v74_v26 = vsel %vm73_vm1, %v65_v11, %v72_v23 }
  0x9d   :  { %v77_v31 = vsel %vm75_vm3, %v76_v28, %v74_v26 }
  0x9e   :  { %v88_v24 = vsub.f32 1.5, %v87_v22 }
  0xa0   :  { %v89_v25 = vmul.f32 %v143_v18, %v88_v24 }
  0xa2   :  { %v90_v27 = vmul.f32 %v89_v25, %v83_v14 }
  0xa4   :  { %v92_v30 = vsel %vm91_vm2, %v83_v14, %v90_v27 }
  0xa5   :  { %v95_v32 = vsel %vm93_vm4, %v94_v29, %v92_v30 }
  0xa6   :  { %v96_v33 = vsub.f32 %v77_v31, %v95_v32 }
  0xa8   :  { %v97_v34 = vadd.f32 1.0, %v96_v33 }
  0xaa   :  { %v98_v35 = vmax.f32 %v97_v34, 0.0 }
  0xac   :  { %v103_v36 = vsel %vm102_vm5, %v98_v35, 0.0 }
  0xad   :  { %104 = vadd.xlane.f32.xlu1 %v103_v36 }
 0x120   :  { %v105_v37 = vpop.xlane.xlu1 %104 }
 0x121   :  { %v106_v38 = vrot.slane %v105_v37, 4 }
 0x123   :  { %v107_v39 = vadd.f32 %v106_v38, %v105_v37 }
 0x125   :  { %v108_v40 = vrot.slane %v107_v39, 2 }
 0x127   :  { %v109_v41 = vadd.f32 %v108_v40, %v107_v39 }
 0x129   :  { %v110_v42 = vrot.slane %v109_v41, 1 }
 0x12b   :  { %v111_v43 = vadd.f32 %v110_v42, %v109_v41 }
 0x12d   :  { %134 = vpush %v111_v43 }
 0x15e   :  { %s135_s29 = spop %134 }
 0x15f   :  { %v113_v46 = vstv %s135_s29 }
 0x160   :  { %v114_v47 = vsel %vm101_vm6, %v113_v46, 0.0 }
 0x161   :  { %115 = vst [vmem:[#allocation8] sm:$0x1] %v114_v47 }
 0x162   :  { %126 = dma.vmem_to_hbm [thread:$0]  %s122_s2, 16, %s124_s28, [#allocation4]  }
 0x163   :  { %244 = dma.done.wait [#allocation4], 16  }
 0x164   :  { %245 = vsyncadd [#allocation4], 4294967280 }
 0x165   :  { %131 = vsyncpa [#allocation3], 1 }
 0x166   :  { %132 = vsyncpa [#allocation6], 1 }
 0x167   :  { %133 = vsyncpa [#allocation4], 1 }

</bundles_post_ra>
